<compile_context>
chip_gen: v6e
topology: v6e:2x2x1
jax: 0.10.0
libtpu: 0.0.40
codegen_flags: <defaults>
</compile_context>

<pallas_src>
import functools

import jax
import jax.numpy as jnp
from jax import lax
from jax.experimental import pallas as pl
from jax.experimental.pallas import tpu as pltpu


# ----------------------------- config ---------------------------------------
HIDDEN = 32
NUM_HEADS = 4
NUM_KV_HEADS = 2
HEAD_DIM = HIDDEN // NUM_HEADS          # 8
SEQ = 8
ATTN_MULTIPLIER = 0.5                   # config.attention_multiplier (attn scale)
ROPE_THETA = 10000.0
ATTENTION_BIAS = False                  # Granite default -> no qkv / o bias

Q_SIZE = NUM_HEADS * HEAD_DIM           # 32
KV_SIZE = NUM_KV_HEADS * HEAD_DIM       # 16
QK_SIZE = Q_SIZE + KV_SIZE              # 48
QKV_SIZE = Q_SIZE + 2 * KV_SIZE         # 64
QKV_EXT_SIZE = QKV_SIZE + QK_SIZE       # 112 (extra rotated q|k columns)
GQA_GROUP = NUM_HEADS // NUM_KV_HEADS   # 2
NEG_BIG = -1e30                         # finite additive mask (padding-safe)


# ----------------------------- fused kernel ----------------------------------
def _fused_attn_kernel(x_ref, wqkv_ref, wo_ref, const_ref, o_ref,
                       *, num_heads, num_kv_heads, head_dim, scale):
    seq = x_ref.shape[0]
    group = num_heads // num_kv_heads
    q_size = num_heads * head_dim
    kv_size = num_kv_heads * head_dim
    qk_size = q_size + kv_size
    v_off = qk_size
    rot_off = qk_size + kv_size

    # packed constants: [ cos_qk (S,48) | sin_qk (S,48) | causal bias (S,S) ]
    const = const_ref[...]
    cos_qk = const[:, 0:qk_size]
    sin_qk = const[:, qk_size:2 * qk_size]
    bias = const[:, 2 * qk_size:2 * qk_size + seq]                # (S, S)

    # 1. ONE extended qkv matmul on the MXU.  Columns [rot_off:] are the
    #    sign-folded, half-swapped copies of the q|k weight columns, so the
    #    rotate-half permutation is computed by the MXU for free.
    qkv = jnp.dot(x_ref[...], wqkv_ref[...],
                  preferred_element_type=jnp.float32)              # (S, 112)

    # 2. full-width neox RoPE: a single elementwise FMA pair over q|k.
    qk = qkv[:, :qk_size]                                          # (S, 48)
    qk_rot = qkv[:, rot_off:rot_off + qk_size]                     # (S, 48)
    qk_roped = qk * cos_qk + qk_rot * sin_qk                       # (S, 48)

    v = qkv[:, v_off:v_off + kv_size]                              # (S, 16)

    # 3. per-head scores (no transposes: contract dim 1 of both operands),
    #    stacked along sublanes so the softmax is issued once for all heads.
    dn = (((1,), (1,)), ((), ()))
    scores = []
    for h in range(num_heads):
        g = h // group
        q_h = qk_roped[:, h * head_dim:(h + 1) * head_dim]         # (S, D)
        k_g = qk_roped[:, q_size + g * head_dim:
                       q_size + (g + 1) * head_dim]                # (S, D)
        scores.append(lax.dot_general(q_h, k_g, dn,
                                      preferred_element_type=jnp.float32))
    s = jnp.concatenate(scores, axis=0) * scale                    # (NH*S, S)
    s = s + jnp.concatenate([bias] * num_heads, axis=0)            # causal bias

    # 4. one batched softmax over all heads (exact normalization).
    s = s - jnp.max(s, axis=-1, keepdims=True)
    p = jnp.exp(s)
    p = p / jnp.sum(p, axis=-1, keepdims=True)                     # (NH*S, S)

    # 5. PV: one matmul per KV group; heads of a group are adjacent sublane
    #    blocks of p, so the group slice is free.
    attn_heads = []
    for g in range(num_kv_heads):
        p_g = p[g * group * seq:(g + 1) * group * seq, :]          # (group*S, S)
        v_g = v[:, g * head_dim:(g + 1) * head_dim]                # (S, D)
        a_g = jnp.dot(p_g, v_g, preferred_element_type=jnp.float32)
        for j in range(group):
            attn_heads.append(a_g[j * seq:(j + 1) * seq, :])       # head g*group+j

    # 6. lane-dense (S, Q_SIZE) slab -> ONE o_proj matmul, one store.
    attn_slab = jnp.concatenate(attn_heads, axis=-1)               # (S, Q_SIZE)
    o_ref[...] = jnp.dot(attn_slab, wo_ref[...],
                         preferred_element_type=jnp.float32)       # (S, HIDDEN)


# ----------------------------- host-side prep ---------------------------------
def make_rope_tables(positions):
    # neox-style: inv_freq over even dims, cos/sin duplicated across halves.
    inv_freq = 1.0 / (ROPE_THETA ** (
        jnp.arange(0, HEAD_DIM, 2, dtype=jnp.float32) / HEAD_DIM))
    freqs = positions.astype(jnp.float32)[:, None] * inv_freq[None, :]  # (S, D/2)
    cos = jnp.concatenate([jnp.cos(freqs), jnp.cos(freqs)], axis=-1)    # (S, D)
    sin = jnp.concatenate([jnp.sin(freqs), jnp.sin(freqs)], axis=-1)    # (S, D)
    return cos, sin


def _rotated_weight_cols(w_block, n_heads):
    """Sign-folded, half-swapped copies of per-head weight columns.

    x @ w_rotated == rotate_half(x @ w_block)  (exact in fp: column permutation
    + sign flip commute with the per-column dot products).
    """
    half = HEAD_DIM // 2
    perm = (jnp.arange(HEAD_DIM) + half) % HEAD_DIM
    sign = jnp.where(jnp.arange(HEAD_DIM) < half, -1.0, 1.0).astype(jnp.float32)
    w = w_block.reshape(HIDDEN, n_heads, HEAD_DIM)
    w = w[:, :, perm] * sign[None, None, :]
    return w.reshape(HIDDEN, n_heads * HEAD_DIM)


@jax.jit
def granite_attention_forward(positions, hidden_states, wqkv_t, wo_t):
    """positions: (S,) int32; hidden_states: (S, H) f32.
    wqkv_t: (H, QKV_SIZE) pre-transposed qkv_proj weight (cols = [q | k | v]).
    wo_t:   (Q_SIZE, H)   pre-transposed o_proj weight.
    attention_bias=False -> no biases (matches Granite config default).
    """
    # Extended qkv weight: [ q | k | v | rot(q) | rot(k) ]  -> (H, 112)
    wq = wqkv_t[:, :Q_SIZE]
    wk = wqkv_t[:, Q_SIZE:Q_SIZE + KV_SIZE]
    wqkv_ext = jnp.concatenate(
        [wqkv_t,
         _rotated_weight_cols(wq, NUM_HEADS),
         _rotated_weight_cols(wk, NUM_KV_HEADS)], axis=1)

    # Packed constants: cos/sin tiled to full q|k width + additive causal bias.
    cos, sin = make_rope_tables(positions)                          # (S, D) each
    n_rep = NUM_HEADS + NUM_KV_HEADS
    cos_qk = jnp.concatenate([cos] * n_rep, axis=-1)                # (S, 48)
    sin_qk = jnp.concatenate([sin] * n_rep, axis=-1)                # (S, 48)
    causal = jnp.tril(jnp.ones((SEQ, SEQ), dtype=bool))
    bias = jnp.where(causal, 0.0, NEG_BIG).astype(jnp.float32)      # (S, S)
    const = jnp.concatenate([cos_qk, sin_qk, bias], axis=-1)        # (S, 104)

    kernel = functools.partial(
        _fused_attn_kernel,
        num_heads=NUM_HEADS, num_kv_heads=NUM_KV_HEADS,
        head_dim=HEAD_DIM, scale=ATTN_MULTIPLIER)

    vmem = pl.BlockSpec(memory_space=pltpu.MemorySpace.VMEM)
    # Single fused pallas_call, no grid: total working set < 20 KB -> resident.
    return pl.pallas_call(
        kernel,
        out_shape=jax.ShapeDtypeStruct((SEQ, HIDDEN), jnp.float32),
        in_specs=[vmem, vmem, vmem, vmem],
        out_specs=vmem,
    )(hidden_states, wqkv_ext, wo_t, const)


# ----------------------------- pure-JAX reference ----------------------------
def reference_forward(positions, hidden_states, wqkv_t, wo_t):
    qkv = hidden_states @ wqkv_t
    q = qkv[:, :Q_SIZE].reshape(SEQ, NUM_HEADS, HEAD_DIM)
    k = qkv[:, Q_SIZE:Q_SIZE + KV_SIZE].reshape(SEQ, NUM_KV_HEADS, HEAD_DIM)
    v = qkv[:, Q_SIZE + KV_SIZE:].reshape(SEQ, NUM_KV_HEADS, HEAD_DIM)

    cos, sin = make_rope_tables(positions)

    def rope(x):  # x: (S, nH, D) -- standard neox formulation
        half = HEAD_DIM // 2
        x1, x2 = x[..., :half], x[..., half:]
        rot = jnp.concatenate([-x2, x1], axis=-1)
        return x * cos[:, None, :] + rot * sin[:, None, :]

    q = rope(q)
    k = rope(k)

    # GQA expand
    k = jnp.repeat(k, GQA_GROUP, axis=1)
    v = jnp.repeat(v, GQA_GROUP, axis=1)

    scores = jnp.einsum('shd,thd->hst', q, k) * ATTN_MULTIPLIER
    mask = jnp.tril(jnp.ones((SEQ, SEQ), dtype=bool))
    scores = jnp.where(mask[None], scores, -jnp.inf)
    probs = jax.nn.softmax(scores, axis=-1)
    out = jnp.einsum('hst,thd->shd', probs, v).reshape(SEQ, Q_SIZE)
    return out @ wo_t


# ----------------------------- main ------------------------------------------
if __name__ == "__main__":
    key = jax.random.PRNGKey(0)
    k1, k2, k3 = jax.random.split(key, 3)

    hidden_states = jax.random.normal(k1, (SEQ, HIDDEN), dtype=jnp.float32)
    positions = jnp.arange(SEQ, dtype=jnp.int32)

    # qkv_proj.weight: (QKV_SIZE, HIDDEN) in nn.Linear convention; pre-transpose.
    wqkv = jax.random.normal(k2, (QKV_SIZE, HIDDEN), dtype=jnp.float32) * 0.05
    # o_proj.weight: (HIDDEN, Q_SIZE); pre-transpose.
    wo = jax.random.normal(k3, (HIDDEN, Q_SIZE), dtype=jnp.float32) * 0.05
    wqkv_t = wqkv.T
    wo_t = wo.T

    out = granite_attention_forward(positions, hidden_states, wqkv_t, wo_t)
    out = jax.block_until_ready(out)

    ref = reference_forward(positions, hidden_states, wqkv_t, wo_t)
    assert out.shape == (SEQ, HIDDEN)
    # Exact softmax divide in-kernel; remaining differences are only MXU f32
    # rounding / reduction-order effects.  Real semantic bugs would be >> 1e-2.
    err = jnp.max(jnp.abs(out - ref))
    assert jnp.allclose(out, ref, rtol=1e-3, atol=1e-3), f"max abs err {err}"

    print("KERNEL_OK")
</pallas_src>

<mosaic_0001>
module attributes {stable_mosaic.version = 11 : i64} {
  func.func @_fused_attn_kernel(%arg0: memref<8x32xf32, #tpu.memory_space<vmem>>, %arg1: memref<32x112xf32, #tpu.memory_space<vmem>>, %arg2: memref<32x32xf32, #tpu.memory_space<vmem>>, %arg3: memref<8x104xf32, #tpu.memory_space<vmem>>, %arg4: memref<8x32xf32, #tpu.memory_space<vmem>>) attributes {dimension_semantics = [], scalar_prefetch = 0 : i64, scratch_operands = 0 : i64, tpu.core_type = #tpu.core_type<tc>} {
    %c0 = arith.constant 0 : index
    %c0_0 = arith.constant 0 : index
    %0 = vector.load %arg3[%c0, %c0_0] : memref<8x104xf32, #tpu.memory_space<vmem>>, vector<8x104xf32>
    %1 = vector.extract_strided_slice %0 {offsets = [0, 0], sizes = [8, 48], strides = [1, 1]} : vector<8x104xf32> to vector<8x48xf32>
    %2 = vector.extract_strided_slice %0 {offsets = [0, 48], sizes = [8, 48], strides = [1, 1]} : vector<8x104xf32> to vector<8x48xf32>
    %3 = vector.extract_strided_slice %0 {offsets = [0, 96], sizes = [8, 8], strides = [1, 1]} : vector<8x104xf32> to vector<8x8xf32>
    %c0_1 = arith.constant 0 : index
    %c0_2 = arith.constant 0 : index
    %4 = vector.load %arg0[%c0_1, %c0_2] : memref<8x32xf32, #tpu.memory_space<vmem>>, vector<8x32xf32>
    %c0_3 = arith.constant 0 : index
    %c0_4 = arith.constant 0 : index
    %5 = vector.load %arg1[%c0_3, %c0_4] : memref<32x112xf32, #tpu.memory_space<vmem>>, vector<32x112xf32>
    %cst = arith.constant dense<0.000000e+00> : vector<8x112xf32>
    %6 = tpu.matmul %4, %5, %cst {dimension_numbers = #tpu.dot_dimension_numbers<[1], [0], [0], [1], [0, 0, 1, 1], [], []>} : vector<8x32xf32>, vector<32x112xf32>, vector<8x112xf32> -> vector<8x112xf32>
    %7 = vector.extract_strided_slice %6 {offsets = [0, 0], sizes = [8, 48], strides = [1, 1]} : vector<8x112xf32> to vector<8x48xf32>
    %8 = vector.extract_strided_slice %6 {offsets = [0, 64], sizes = [8, 48], strides = [1, 1]} : vector<8x112xf32> to vector<8x48xf32>
    %9 = arith.mulf %7, %1 : vector<8x48xf32>
    %10 = arith.mulf %8, %2 : vector<8x48xf32>
    %11 = arith.addf %9, %10 : vector<8x48xf32>
    %12 = vector.extract_strided_slice %6 {offsets = [0, 48], sizes = [8, 16], strides = [1, 1]} : vector<8x112xf32> to vector<8x16xf32>
    %13 = vector.extract_strided_slice %11 {offsets = [0, 0], sizes = [8, 8], strides = [1, 1]} : vector<8x48xf32> to vector<8x8xf32>
    %14 = vector.extract_strided_slice %11 {offsets = [0, 32], sizes = [8, 8], strides = [1, 1]} : vector<8x48xf32> to vector<8x8xf32>
    %cst_5 = arith.constant dense<0.000000e+00> : vector<8x8xf32>
    %15 = tpu.matmul %13, %14, %cst_5 {dimension_numbers = #tpu.dot_dimension_numbers<[1], [1], [0], [0], [0, 0, 1, 0], [], []>} : vector<8x8xf32>, vector<8x8xf32>, vector<8x8xf32> -> vector<8x8xf32>
    %16 = vector.extract_strided_slice %11 {offsets = [0, 8], sizes = [8, 8], strides = [1, 1]} : vector<8x48xf32> to vector<8x8xf32>
    %17 = vector.extract_strided_slice %11 {offsets = [0, 32], sizes = [8, 8], strides = [1, 1]} : vector<8x48xf32> to vector<8x8xf32>
    %cst_6 = arith.constant dense<0.000000e+00> : vector<8x8xf32>
    %18 = tpu.matmul %16, %17, %cst_6 {dimension_numbers = #tpu.dot_dimension_numbers<[1], [1], [0], [0], [0, 0, 1, 0], [], []>} : vector<8x8xf32>, vector<8x8xf32>, vector<8x8xf32> -> vector<8x8xf32>
    %19 = vector.extract_strided_slice %11 {offsets = [0, 16], sizes = [8, 8], strides = [1, 1]} : vector<8x48xf32> to vector<8x8xf32>
    %20 = vector.extract_strided_slice %11 {offsets = [0, 40], sizes = [8, 8], strides = [1, 1]} : vector<8x48xf32> to vector<8x8xf32>
    %cst_7 = arith.constant dense<0.000000e+00> : vector<8x8xf32>
    %21 = tpu.matmul %19, %20, %cst_7 {dimension_numbers = #tpu.dot_dimension_numbers<[1], [1], [0], [0], [0, 0, 1, 0], [], []>} : vector<8x8xf32>, vector<8x8xf32>, vector<8x8xf32> -> vector<8x8xf32>
    %22 = vector.extract_strided_slice %11 {offsets = [0, 24], sizes = [8, 8], strides = [1, 1]} : vector<8x48xf32> to vector<8x8xf32>
    %23 = vector.extract_strided_slice %11 {offsets = [0, 40], sizes = [8, 8], strides = [1, 1]} : vector<8x48xf32> to vector<8x8xf32>
    %cst_8 = arith.constant dense<0.000000e+00> : vector<8x8xf32>
    %24 = tpu.matmul %22, %23, %cst_8 {dimension_numbers = #tpu.dot_dimension_numbers<[1], [1], [0], [0], [0, 0, 1, 0], [], []>} : vector<8x8xf32>, vector<8x8xf32>, vector<8x8xf32> -> vector<8x8xf32>
    %25 = tpu.concatenate %15, %18, %21, %24 in 0 : vector<8x8xf32>, vector<8x8xf32>, vector<8x8xf32>, vector<8x8xf32> -> vector<32x8xf32>
    %cst_9 = arith.constant 5.000000e-01 : f32
    %26 = vector.broadcast %cst_9 : f32 to vector<32x8xf32>
    %27 = arith.mulf %25, %26 : vector<32x8xf32>
    %28 = tpu.concatenate %3, %3, %3, %3 in 0 : vector<8x8xf32>, vector<8x8xf32>, vector<8x8xf32>, vector<8x8xf32> -> vector<32x8xf32>
    %29 = arith.addf %27, %28 : vector<32x8xf32>
    %cst_10 = arith.constant dense<0xFF800000> : vector<32xf32>
    %30 = vector.multi_reduction <maximumf>, %29, %cst_10 [1] : vector<32x8xf32> to vector<32xf32>
    %31 = vector.shape_cast %30 : vector<32xf32> to vector<32x1xf32>
    %32 = vector.broadcast %31 : vector<32x1xf32> to vector<32x8xf32>
    %33 = arith.subf %29, %32 : vector<32x8xf32>
    %34 = math.exp %33 : vector<32x8xf32>
    %cst_11 = arith.constant dense<0.000000e+00> : vector<32xf32>
    %35 = vector.multi_reduction <add>, %34, %cst_11 [1] : vector<32x8xf32> to vector<32xf32>
    %36 = vector.shape_cast %35 : vector<32xf32> to vector<32x1xf32>
    %37 = vector.broadcast %36 : vector<32x1xf32> to vector<32x8xf32>
    %38 = arith.divf %34, %37 : vector<32x8xf32>
    %39 = vector.extract_strided_slice %38 {offsets = [0, 0], sizes = [16, 8], strides = [1, 1]} : vector<32x8xf32> to vector<16x8xf32>
    %40 = vector.extract_strided_slice %12 {offsets = [0, 0], sizes = [8, 8], strides = [1, 1]} : vector<8x16xf32> to vector<8x8xf32>
    %cst_12 = arith.constant dense<0.000000e+00> : vector<16x8xf32>
    %41 = tpu.matmul %39, %40, %cst_12 {dimension_numbers = #tpu.dot_dimension_numbers<[1], [0], [0], [1], [0, 0, 1, 1], [], []>} : vector<16x8xf32>, vector<8x8xf32>, vector<16x8xf32> -> vector<16x8xf32>
    %42 = vector.extract_strided_slice %41 {offsets = [0, 0], sizes = [8, 8], strides = [1, 1]} : vector<16x8xf32> to vector<8x8xf32>
    %43 = vector.extract_strided_slice %41 {offsets = [8, 0], sizes = [8, 8], strides = [1, 1]} : vector<16x8xf32> to vector<8x8xf32>
    %44 = vector.extract_strided_slice %38 {offsets = [16, 0], sizes = [16, 8], strides = [1, 1]} : vector<32x8xf32> to vector<16x8xf32>
    %45 = vector.extract_strided_slice %12 {offsets = [0, 8], sizes = [8, 8], strides = [1, 1]} : vector<8x16xf32> to vector<8x8xf32>
    %cst_13 = arith.constant dense<0.000000e+00> : vector<16x8xf32>
    %46 = tpu.matmul %44, %45, %cst_13 {dimension_numbers = #tpu.dot_dimension_numbers<[1], [0], [0], [1], [0, 0, 1, 1], [], []>} : vector<16x8xf32>, vector<8x8xf32>, vector<16x8xf32> -> vector<16x8xf32>
    %47 = vector.extract_strided_slice %46 {offsets = [0, 0], sizes = [8, 8], strides = [1, 1]} : vector<16x8xf32> to vector<8x8xf32>
    %48 = vector.extract_strided_slice %46 {offsets = [8, 0], sizes = [8, 8], strides = [1, 1]} : vector<16x8xf32> to vector<8x8xf32>
    %49 = tpu.concatenate %42, %43, %47, %48 in 1 : vector<8x8xf32>, vector<8x8xf32>, vector<8x8xf32>, vector<8x8xf32> -> vector<8x32xf32>
    %c0_14 = arith.constant 0 : index
    %c0_15 = arith.constant 0 : index
    %50 = vector.load %arg2[%c0_14, %c0_15] : memref<32x32xf32, #tpu.memory_space<vmem>>, vector<32x32xf32>
    %cst_16 = arith.constant dense<0.000000e+00> : vector<8x32xf32>
    %51 = tpu.matmul %49, %50, %cst_16 {dimension_numbers = #tpu.dot_dimension_numbers<[1], [0], [0], [1], [0, 0, 1, 1], [], []>} : vector<8x32xf32>, vector<32x32xf32>, vector<8x32xf32> -> vector<8x32xf32>
    %c0_17 = arith.constant 0 : index
    %c0_18 = arith.constant 0 : index
    %52 = vector.load %arg4[%c0_17, %c0_18] : memref<8x32xf32, #tpu.memory_space<vmem>>, vector<8x32xf32>
    tpu.vector_store %arg4[%c0_17, %c0_18], %51 {strides = array<i32>} : memref<8x32xf32, #tpu.memory_space<vmem>>, vector<8x32xf32>,
    return
  }
}

</mosaic_0001>

<bundles_post_ra>
// kernel: granite_attention_forward.1
= control target key start
LH: loop header
LB: loop body
LE: loop exit
PB: predicated region body
PF: predicated region fallthrough
CT: control target
= control target key end

     0   :  { %v889_v1 = vmov 0.0   ;;  %vm890_vm0 = vmmov 0   ;;  %s891_s21 = smov 16   ;;  %s1018_s0 = inlined_call_operand.vmem [shape: f32[8,32], index: 0, kind: input, shape index: {}]   ;;  %s1019_s1 = inlined_call_operand.vmem [shape: f32[32,112], index: 1, kind: input, shape index: {}]   ;;  %s1020_s2 = inlined_call_operand.vmem [shape: f32[32,32], index: 2, kind: input, shape index: {}]   ;;  %s1021_s3 = inlined_call_operand.vmem [shape: f32[8,104], index: 3, kind: input, shape index: {}]   ;;  %s1022_s4 = inlined_call_operand.hbm [shape: f32[8,32], index: 4, kind: output, shape index: {}]  }
   0x1   :  { %v23_v0 = vld [vmem:[%s1019_s1 + $0x18] sm:$0xff]  ;;  %784 = vmatprep.subr.mxu0 %v889_v1  ;;  %v22_v2 = vld [vmem:[%s1019_s1 + $0x10] sm:$0xff]  ;;  %792 = vmatprep.mubr.msk.f32.mxu0 %vm890_vm0, %v889_v1  ;;  %v18_v3 = vld [vmem:[%s1021_s3] sm:$0xff] }
   0x2   :  { %785 = vmatpush3.msra.mxu0 %v23_v0  ;;  %100 = vrot.lane.b32.xlu0 %v18_v3, %s891_s21 }
   0x3   :  { %9 = vsyncpa [#allocation3], 0  ;;  %786 = vmatprep.subr.mxu0 %v889_v1  ;;  %v21_v4 = vld [vmem:[%s1019_s1 + $0x8] sm:$0xff]  ;;  %795 = vmatprep.subr.mxu1 %v889_v1  ;;  %v20_v5 = vld [vmem:[%s1019_s1] sm:$0xff]  ;;  %vm24_vm1 = vcmask 261120   ;;  %s892_s27 = smov 64  }
   0x4   :  { %787 = vmatpush3.msra.mxu0 %v22_v2  ;;  %797 = vmatprep.mubr.msk.f32.mxu1 %vm890_vm0, %v889_v1  ;;  %v19_v6 = vld [vmem:[%s1018_s0] sm:$0xff]  ;;  %s893_s1 = smov 88   ;;  %s894_s0 = smov 96   ;;  %vm112_vm2 = vcmask 64512   ;;  %vm650_vm3 = vcmask 130048   ;;  %vm652_vm4 = vcmask 195584  }
   0x5   :  { %788 = vmatprep.subr.mxu0 %v889_v1  ;;  %s895_s28 = smov 104   ;;  %s896_s29 = smov 120  }
   0x6   :  { %789 = vmatpush3.msra.mxu0 %v21_v4  ;;  %s897_s30 = smov 112   ;;  %s898_s5 = smov 32  }
   0x7   :  { %790 = vmatprep.subr.mxu0 %v889_v1  ;;  %s899_s6 = smov 72   ;;  %s900_s7 = smov 80  }
   0x8   :  { %791 = vmatpush3.msra.mxu0 %v20_v5  ;;  %s901_s16 = smov 24   ;;  %s902_s17 = smov 8  }
   0x9   :  { %793 = vmatmul.mubr.msk.f32.vlgmr.msra.gmra.mxu0 %vm24_vm1, %v19_v6 }
  0x74   :  { %v101_v7 = vpop.permute.xlu0 %100 }
  0xc9   :  { %v958_v8 = vpop.f32.mrf.mxu0 }
  0xca   :  { %v103_v9 = vmul.f32 %v101_v7, %v958_v8  ;;  %v98_v11 = vmul.f32 %v958_v8, %v18_v3 }
  0xcb   :  { %v794_v10 = vpop.f32.mrf.mxu0 }
  0xcc   :  { %105 = vrot.lane.b32.xlu0 %v103_v9, %s892_s27 }
 0x13e   :  { %v106_v12 = vpop.permute.xlu0 %105 }
 0x13f   :  { %v108_v13 = vadd.f32 %v106_v12, %v98_v11  ;;  %v657_v11 = vld [vmem:[%s1020_s2 + $0x18] sm:$0xff]  ;;  %v656_v12 = vld [vmem:[%s1020_s2 + $0x10] sm:$0xff] }
 0x141   :  { %263 = vrot.lane.b32.xlu0 %v108_v13, %s893_s1  ;;  %110 = vrot.lane.b32.xlu1 %v108_v13, %s894_s0 }
 0x145   :  { %339 = vrot.lane.b32.xlu0 %v108_v13, %s895_s28  ;;  %187 = vrot.lane.b32.xlu1 %v108_v13, %s896_s29 }
 0x149   :  { %261 = vrot.lane.b32.xlu1 %v108_v13, %s897_s30 }
 0x14d   :  { %417 = vrot.lane.b32.xlu1 %v18_v3, %s898_s5 }
 0x1b3   :  { %v111_v14 = vpop.permute.xlu1 %110  ;;  %v264_v16 = vpop.permute.xlu0 %263 }
 0x1b4   :  { %796 = vmatpush3.xpose.msk.msra.mxu1 %vm112_vm2, %v111_v14 }
 0x1b5   :  { %800 = vmatprep.subr.mxu1 %v889_v1 }
 0x1b7   :  { %798 = vmatmul.mubr.msk.f32.vlgmr.msra.gmra.mxu1 %vm112_vm2, %v108_v13  ;;  %v188_v15 = vpop.permute.xlu1 %187  ;;  %v340_v18 = vpop.permute.xlu0 %339  ;;  %v655_v13 = vld [vmem:[%s1020_s2 + $0x8] sm:$0xff] }
 0x1b8   :  { %801 = vmatpush3.xpose.msk.msra.mxu1 %vm112_vm2, %v111_v14  ;;  %802 = vmatprep.mubr.msk.f32.mxu1 %vm890_vm0, %v889_v1  ;;  %v654_v14 = vld [vmem:[%s1020_s2] sm:$0xff]  ;;  %s903_s2 = smov [#allocation2]  }
 0x1b9   :  { %805 = vmatprep.subr.mxu1 %v889_v1  ;;  %s738_s18 = sshll.u32 %s903_s2, 4  ;;  %s739_s18 = int_to_ptr.vmem [resolvable:$true] %s738_s18 }
 0x1ba   :  { %s867_s19 = scalar_lea.vmem %s739_s18, 128  ;;  %p872_p1 = scmp.lt.s32.totalorder %s739_s18, %s739_s18 }
 0x1bb   :  { %803 = vmatmul.mubr.msk.f32.vlgmr.msra.gmra.mxu1 %vm112_vm2, %v188_v15  ;;  %v262_v17 = vpop.permute.xlu1 %261  ;;  %p868_p0 = scmp.ne.s32.totalorder %s739_s18, %s867_s19  ;;  %p873_p2 = scmp.lt.s32.totalorder %s867_s19, %s867_s19 }
 0x1bc   :  { %806 = vmatpush3.xpose.msk.msra.mxu1 %vm112_vm2, %v264_v16  ;;  %807 = vmatprep.mubr.msk.f32.mxu1 %vm890_vm0, %v889_v1 }
 0x1bd   :  { %810 = vmatprep.subr.mxu1 %v889_v1  ;;  %p874_p3 = por %p873_p2, %p872_p1 }
 0x1bf   :  { %808 = vmatmul.mubr.msk.f32.vlgmr.msra.gmra.mxu1 %vm112_vm2, %v262_v17  ;;  %v418_v20 = vpop.permute.xlu1 %417  ;;  %p875_p4 = pnand %p874_p3, %p868_p0 }
 0x1c0   :  { %811 = vmatpush3.xpose.msk.msra.mxu1 %vm112_vm2, %v264_v16  ;;  %812 = vmatprep.mubr.msk.f32.mxu1 %vm890_vm0, %v889_v1 }
 0x1c3   :  { %813 = vmatmul.mubr.msk.f32.vlgmr.msra.gmra.mxu1 %vm112_vm2, %v340_v18 }
 0x277   :  { %v183_v19 = vpop.f32.mrf.mxu1 }
 0x278   :  { %v413_v21 = vmul.f32 0.5, %v183_v19 }
 0x279   :  { %v799_v22 = vpop.f32.mrf.mxu1 }
 0x27a   :  { %v420_v23 = vadd.f32 %v418_v20, %v413_v21 }
 0x27b   :  { %v257_v24 = vpop.f32.mrf.mxu1 }
 0x27c   :  { %v424_v25 = vsel %vm112_vm2, %v420_v23, -inf  ;;  %v414_v32 = vmul.f32 0.5, %v257_v24 }
 0x27d   :  { %v804_v26 = vpop.f32.mrf.mxu1  ;;  %425 = vmax.xlane.f32.xlu1 %v424_v25 }
 0x27e   :  { %v421_v38 = vadd.f32 %v418_v20, %v414_v32 }
 0x27f   :  { %v335_v27 = vpop.f32.mrf.mxu1 }
 0x280   :  { %v415_v28 = vmul.f32 0.5, %v335_v27  ;;  %v427_v39 = vsel %vm112_vm2, %v421_v38, -inf }
 0x281   :  { %v809_v29 = vpop.f32.mrf.mxu1 }
 0x282   :  { %v422_v30 = vadd.f32 %v418_v20, %v415_v28 }
 0x283   :  { %v409_v31 = vpop.f32.mrf.mxu1 }
 0x284   :  { %v416_v33 = vmul.f32 0.5, %v409_v31  ;;  %v430_v34 = vsel %vm112_vm2, %v422_v30, -inf }
 0x285   :  { %v814_v35 = vpop.f32.mrf.mxu1  ;;  %431 = vmax.xlane.f32.xlu0 %v430_v34 }
 0x286   :  { %v423_v36 = vadd.f32 %v418_v20, %v416_v33 }
 0x288   :  { %v433_v37 = vsel %vm112_vm2, %v423_v36, -inf }
 0x289   :  { %434 = vmax.xlane.f32.xlu0 %v433_v37 }
 0x28d   :  { %428 = vmax.xlane.f32.xlu0 %v427_v39 }
 0x306   :  { %v426_v40 = vpop.xlane.xlu1 %425 }
 0x307   :  { %v436_v41 = vsub.f32 %v420_v23, %v426_v40 }
 0x309   :  { %v440_v42 = vmul.f32 1.442695, %v436_v41 }
 0x30b   :  { %851 = vpow2.f32 %v440_v42 }
 0x30e   :  { %v432_v43 = vpop.xlane.xlu0 %431 }
 0x30f   :  { %v438_v44 = vsub.f32 %v422_v30, %v432_v43 }
 0x311   :  { %v444_v45 = vmul.f32 1.442695, %v438_v44 }
 0x312   :  { %v435_v46 = vpop.xlane.xlu0 %434 }
 0x313   :  { %853 = vpow2.f32 %v444_v45  ;;  %v439_v47 = vsub.f32 %v423_v36, %v435_v46 }
 0x315   :  { %v446_v48 = vmul.f32 1.442695, %v439_v47 }
 0x316   :  { %v429_v49 = vpop.xlane.xlu0 %428 }
 0x317   :  { %855 = vpow2.f32 %v446_v48  ;;  %v437_v50 = vsub.f32 %v421_v38, %v429_v49 }
 0x318   :  { %v852_v51 = vpop.eup %851 }
 0x319   :  { %v442_v52 = vmul.f32 1.442695, %v437_v50  ;;  %v448_v53 = vsel %vm112_vm2, %v852_v51, 0.0 }
 0x31a   :  { %449 = vadd.xlane.f32.xlu0 %v448_v53 }
 0x31b   :  { %857 = vpow2.f32 %v442_v52 }
 0x320   :  { %v854_v54 = vpop.eup %853 }
 0x321   :  { %v454_v55 = vsel %vm112_vm2, %v854_v54, 0.0 }
 0x322   :  { %455 = vadd.xlane.f32.xlu1 %v454_v55 }
 0x324   :  { %v856_v56 = vpop.eup %855 }
 0x325   :  { %v457_v57 = vsel %vm112_vm2, %v856_v56, 0.0 }
 0x326   :  { %458 = vadd.xlane.f32.xlu1 %v457_v57 }
 0x328   :  { %v858_v58 = vpop.eup %857 }
 0x329   :  { %v451_v59 = vsel %vm112_vm2, %v858_v58, 0.0 }
 0x32a   :  { %452 = vadd.xlane.f32.xlu0 %v451_v59 }
 0x337   :  { %553 = vrot.lane.b32.xlu1 %v958_v8, %s899_s6 }
 0x340   :  { %469 = vrot.lane.b32.xlu0 %v958_v8, %s900_s7 }
 0x3a3   :  { %v450_v60 = vpop.xlane.xlu0 %449 }
 0x3a4   :  { %859 = vrcp.f32 %v450_v60 }
 0x3ab   :  { %v456_v61 = vpop.xlane.xlu1 %455 }
 0x3ac   :  { %861 = vrcp.f32 %v456_v61 }
 0x3af   :  { %v459_v62 = vpop.xlane.xlu1 %458 }
 0x3b0   :  { %863 = vrcp.f32 %v459_v62 }
 0x3b1   :  { %v860_v63 = vpop.eup %859 }
 0x3b2   :  { %v461_v0 = vmul.f32 %v860_v63, %v852_v51 }
 0x3b3   :  { %v453_v2 = vpop.xlane.xlu0 %452  ;;  %v554_v3 = vpop.permute.xlu1 %553 }
 0x3b4   :  { %865 = vrcp.f32 %v453_v2  ;;  %817 = vmatprep.mubr.msk.f32.mxu0 %vm112_vm2, %v461_v0  ;;  %820 = vmatprep.subr.mxu1 %v554_v3 }
 0x3b5   :  { %821 = vmatpush3.msra.mxu1 %v554_v3 }
 0x3b7   :  { %v470_v4 = vpop.permute.xlu0 %469 }
 0x3b8   :  { %815 = vmatprep.subr.mxu0 %v470_v4 }
 0x3b9   :  { %v862_v5 = vpop.eup %861  ;;  %816 = vmatpush3.msra.mxu0 %v470_v4 }
 0x3ba   :  { %v465_v6 = vmul.f32 %v862_v5, %v854_v54  ;;  %825 = vmatprep.subr.mxu0 %v889_v1 }
 0x3bc   :  { %822 = vmatprep.mubr.msk.f32.mxu1 %vm112_vm2, %v465_v6 }
 0x3bd   :  { %v864_v7 = vpop.eup %863 }
 0x3be   :  { %v467_v8 = vmul.f32 %v864_v7, %v856_v56 }
 0x3c0   :  { %823 = vmatmul.mubr.msk.f32.vlgmr.msra.gmra.mxu1 %vm112_vm2, %v467_v8 }
 0x3c1   :  { %v866_v9 = vpop.eup %865 }
 0x3c2   :  { %v463_v10 = vmul.f32 %v866_v9, %v858_v58 }
 0x3c4   :  { %818 = vmatmul.mubr.msk.f32.vlgmr.msra.gmra.mxu0 %vm112_vm2, %v463_v10 }
 0x3c5   :  { %833 = vmatprep.mubr.msk.f32.mxu0 %vm890_vm0, %v889_v1  ;;  %826 = vmatpush3.msra.mxu0 %v657_v11 }
 0x3c6   :  { %827 = vmatprep.subr.mxu0 %v889_v1 }
 0x3c7   :  { %828 = vmatpush3.msra.mxu0 %v656_v12 }
 0x3c8   :  { %829 = vmatprep.subr.mxu0 %v889_v1 }
 0x3c9   :  { %830 = vmatpush3.msra.mxu0 %v655_v13 }
 0x3ca   :  { %831 = vmatprep.subr.mxu0 %v889_v1 }
 0x3cb   :  { %832 = vmatpush3.msra.mxu0 %v654_v14 }
 0x480   :  { %v824_v15 = vpop.f32.mrf.mxu1 }
 0x481   :  { %646 = vrot.lane.b32.xlu0 %v824_v15, %s901_s16 }
 0x482   :  { %v628_v17 = vpop.f32.mrf.mxu1 }
 0x484   :  { %v819_v16 = vpop.f32.mrf.mxu0 }
 0x485   :  { %638 = vrot.lane.b32.xlu1 %v819_v16, %s902_s17 }
 0x486   :  { %v544_v19 = vpop.f32.mrf.mxu0 }
 0x489   :  { %642 = vrot.lane.b32.xlu1 %v628_v17, %s891_s21 }
 0x4f3   :  { %v647_v21 = vpop.permute.xlu0 %646 }
 0x4f7   :  { %v639_v18 = vpop.permute.xlu1 %638 }
 0x4f8   :  { %v649_v1 = vsel %vm112_vm2, %v544_v19, %v639_v18 }
 0x4fb   :  { %v643_v20 = vpop.permute.xlu1 %642 }
 0x4fc   :  { %v651_v22 = vsel %vm650_vm3, %v649_v1, %v643_v20 }
 0x4fd   :  { %v653_v23 = vsel %vm652_vm4, %v651_v22, %v647_v21 }
 0x4fe   :  { %834 = vmatmul.mubr.msk.f32.vlgmr.msra.gmra.mxu0 %vm24_vm1, %v653_v23 }
 0x5be   :  { %v727_v24 = vpop.f32.mrf.mxu0 }
 0x5bf   :  { %731 = vst.msk [vmem:[#allocation2] sm:$0xff] %vm24_vm1, %v727_v24 }
 0x5c0   :  { %v835_v25 = vpop.f32.mrf.mxu0 }
 0x5c1   :  { %878 = shalt.err (!%p875_p4)
}
 0x5c2   :  { %741 = dma.vmem_to_hbm [thread:$0]  %s739_s18, 128, %s1022_s4, [#allocation3]  }
 0x5c3   :  { %887 = dma.done.wait [#allocation3], 128  }
 0x5c4   :  { %888 = vsyncadd [#allocation3], 4294967168 }
 0x5c5   :  { %745 = vsyncpa [#allocation3], 1 }

</bundles_post_ra>
